<compile_context>
chip_gen: v7x
topology: tpu7x:2x2x1
jax: 0.10.0
libtpu: 0.0.40
codegen_flags: <defaults>
</compile_context>

<pallas_src>
import functools

import jax
import jax.numpy as jnp
from jax import lax
from jax.experimental import pallas as pl
from jax.experimental.pallas import tpu as pltpu

_LANE = 128
_ACC_SUBLANES = 8          # f32 accumulator tile = one vreg: (8, 128)
_MAX_TILE_ROWS = 8192


def _round_up(x, m):
    return ((x + m - 1) // m) * m


def _cdiv(a, b):
    return -(-a // b)


def _detect_tpu():
    """Return (tensorcores_per_chip, target per-input block bytes)."""
    try:
        kind = jax.devices()[0].device_kind.lower()
    except Exception:
        kind = ""
    is_v7 = ("v7" in kind) or ("7x" in kind)
    num_tc = 2 if is_v7 else 1                        # v7x: 2 TCs; v5e/v6e: 1
    target_block = (4 << 20) if is_v7 else (1 << 20)  # bigger blocks at 3.2 TB/s
    return num_tc, target_block


_NUM_TC, _TARGET_BLOCK_BYTES = _detect_tpu()


def _partial_sum_kernel(sr_ref, gt_ref, acc_ref, *, compute_sq, tile_rows,
                        rows_total, steps_total, steps_per_slice, has_dup):
    """Accumulate a vreg-shaped (8,128) partial sum of |d| or d^2.

    Grid = (num_slices, steps_per_slice); the accumulator block is resident
    across the inner ("arbitrary") axis and per-slice along the outer axis
    (CORE_PARALLEL on v7x), so there are no cross-core write conflicts.
    """
    c = pl.program_id(0)
    i = pl.program_id(1)
    step = c * steps_per_slice + i            # global block index

    @pl.when(i == 0)
    def _init():
        acc_ref[...] = jnp.zeros_like(acc_ref)

    rows_last = rows_total - (steps_total - 1) * tile_rows   # valid rows in final block
    ragged = rows_last != tile_rows                          # static

    def contrib(mask_rows):
        d = sr_ref[...].astype(jnp.float32) - gt_ref[...].astype(jnp.float32)
        if mask_rows:
            # Only the final block needs this; garbage rows beyond the array
            # (partial-block DMA) and beyond steps_total are zeroed out.
            rid = lax.broadcasted_iota(jnp.int32, d.shape, 0)
            d = jnp.where(rid < rows_last, d, 0.0)
        v = d * d if compute_sq else jnp.abs(d)
        # Layout-preserving split of the sublane axis; the axis-0 reduce is pure
        # VPU adds hidden under the input DMA (no XLU, no scalar RMW).
        acc_ref[...] += jnp.sum(v.reshape(-1, _ACC_SUBLANES, _LANE), axis=0)

    if ragged or has_dup:
        @pl.when(step < steps_total - 1)
        def _bulk():
            contrib(False)

        @pl.when(step == steps_total - 1)
        def _last():
            contrib(ragged)
        # step > steps_total - 1 (duplicate clamped blocks): contribute nothing.
    else:
        contrib(False)


def _sum_of(sr, gt, compute_sq):
    """sum(|sr-gt|) or sum((sr-gt)^2) over all elements, as an f32 scalar.

    Called inside jit: all tiling math is static, reshapes are bitcasts, and at
    most a <128-element zero pad is ever introduced.
    """
    n = sr.size
    itemsize = jnp.dtype(sr.dtype).itemsize

    sr_flat = sr.reshape(-1)
    gt_flat = gt.reshape(-1)
    rem = n % _LANE
    if rem:
        # Pad both inputs identically by <128 zeros so diff = 0 in the pad
        # region; we divide by the true n outside.
        pad = _LANE - rem
        sr_flat = jnp.pad(sr_flat, (0, pad))
        gt_flat = jnp.pad(gt_flat, (0, pad))

    rows_total = sr_flat.size // _LANE
    sr2 = sr_flat.reshape(rows_total, _LANE)
    gt2 = gt_flat.reshape(rows_total, _LANE)

    # Tile rows: as large as the per-chip block-byte target allows (lane-dense,
    # multiple of 8 sublanes), capped at the array size.
    max_rows = max(_ACC_SUBLANES,
                   (_TARGET_BLOCK_BYTES // (_LANE * itemsize))
                   // _ACC_SUBLANES * _ACC_SUBLANES)
    max_rows = min(max_rows, _MAX_TILE_ROWS)
    tile_rows = min(max_rows, _round_up(rows_total, _ACC_SUBLANES))

    steps_total = _cdiv(rows_total, tile_rows)
    num_slices = 2 if (_NUM_TC == 2 and steps_total >= 2) else 1
    steps_per_slice = _cdiv(steps_total, num_slices)
    has_dup = num_slices * steps_per_slice != steps_total

    if has_dup:
        def in_index(c, i):
            # Clamp so no DMA ever starts out of bounds; duplicate blocks are
            # skipped inside the kernel.
            return (jnp.minimum(c * steps_per_slice + i, steps_total - 1), 0)
    else:
        def in_index(c, i):
            return (c * steps_per_slice + i, 0)

    in_spec = pl.BlockSpec((tile_rows, _LANE), in_index)
    out_spec = pl.BlockSpec((None, _ACC_SUBLANES, _LANE), lambda c, i: (c, 0, 0))

    block_in = tile_rows * _LANE * itemsize
    block_f32 = tile_rows * _LANE * 4
    # 2 inputs x 2 pipeline buffers + in-kernel f32 temporaries + accumulator,
    # plus headroom; no artificial 32 MiB floor.
    vmem_limit = int(min(64 << 20,
                         max(8 << 20, 4 * block_in + 3 * block_f32 + (2 << 20))))

    cost = pl.CostEstimate(
        flops=3 * n,
        transcendentals=0,
        bytes_accessed=2 * n * itemsize + num_slices * _ACC_SUBLANES * _LANE * 4,
    )

    sem0 = (getattr(pltpu, "CORE_PARALLEL", pltpu.ARBITRARY)
            if num_slices > 1 else pltpu.ARBITRARY)

    kernel = functools.partial(
        _partial_sum_kernel, compute_sq=compute_sq, tile_rows=tile_rows,
        rows_total=rows_total, steps_total=steps_total,
        steps_per_slice=steps_per_slice, has_dup=has_dup)

    parts = pl.pallas_call(
        kernel,
        out_shape=jax.ShapeDtypeStruct((num_slices, _ACC_SUBLANES, _LANE),
                                       jnp.float32),
        grid_spec=pltpu.PrefetchScalarGridSpec(
            num_scalar_prefetch=0,
            grid=(num_slices, steps_per_slice),
            in_specs=[in_spec, in_spec],
            out_specs=out_spec,
        ),
        compiler_params=pltpu.CompilerParams(
            dimension_semantics=(sem0, pltpu.ARBITRARY),
            vmem_limit_bytes=vmem_limit,
        ),
        cost_estimate=cost,
    )(sr2, gt2)

    # Tiny final cross-lane reduction (num_slices x 8 x 128) fused by XLA.
    return jnp.sum(parts)


@jax.jit
def _l1_loss(sr, gt):
    return _sum_of(sr, gt, compute_sq=False) / sr.size


@jax.jit
def _mse_plus_aux(sr, gt, separateness_loss, compactness_loss):
    mse = _sum_of(sr, gt, compute_sq=True) / sr.size
    return mse + 0.1 * compactness_loss + 0.1 * separateness_loss


def select_loss(sr, gt, separateness_loss=None, compactness_loss=None):
    """JAX/Pallas equivalent of Select_Loss.forward."""
    assert sr.shape == gt.shape
    if separateness_loss is not None and compactness_loss is not None:
        return _mse_plus_aux(sr, gt, separateness_loss, compactness_loss)
    # Default branch (as in the module, incl. when only one aux loss is given).
    return _l1_loss(sr, gt)


if __name__ == "__main__":
    key = jax.random.PRNGKey(0)
    k1, k2, k3, k4 = jax.random.split(key, 4)

    # --- Case 1: NCHW inputs like the PyTorch module, 128-divisible size ---
    B, C, H, W = 2, 4, 16, 16
    sr = jax.random.normal(k1, (B, C, H, W), dtype=jnp.float32)
    gt = jax.random.normal(k2, (B, C, H, W), dtype=jnp.float32)

    loss_l1 = select_loss(sr, gt)                       # default path: L1
    jax.block_until_ready(loss_l1)
    sep = jnp.float32(0.3)
    comp = jnp.float32(0.7)
    loss_mse = select_loss(sr, gt,                      # aux-loss path: MSE
                           separateness_loss=sep, compactness_loss=comp)
    jax.block_until_ready(loss_mse)

    ref_l1 = jnp.mean(jnp.abs(sr - gt))
    ref_mse = jnp.mean((sr - gt) ** 2) + 0.1 * comp + 0.1 * sep
    assert jnp.allclose(loss_l1, ref_l1, rtol=1e-5, atol=1e-5)
    assert jnp.allclose(loss_mse, ref_mse, rtol=1e-5, atol=1e-5)

    # --- Case 2: awkward size exercises <128 pad + ragged-row masking ---
    sr2 = jax.random.normal(k3, (2, 3, 30, 30), dtype=jnp.float32)
    gt2 = jax.random.normal(k4, (2, 3, 30, 30), dtype=jnp.float32)
    loss2 = select_loss(sr2, gt2)
    jax.block_until_ready(loss2)
    ref2 = jnp.mean(jnp.abs(sr2 - gt2))
    assert jnp.allclose(loss2, ref2, rtol=1e-5, atol=1e-5)

    print("KERNEL_OK")
</pallas_src>

<mosaic_0001>
module attributes {stable_mosaic.version = 11 : i64} {
  func.func @_partial_sum_kernel(%arg0: i32, %arg1: i32, %arg2: memref<16x128xf32, #tpu.memory_space<vmem>>, %arg3: memref<16x128xf32, #tpu.memory_space<vmem>>, %arg4: memref<1x8x128xf32, #tpu.memory_space<vmem>>) attributes {dimension_semantics = [#tpu.dimension_semantics<arbitrary>, #tpu.dimension_semantics<arbitrary>], iteration_bounds = array<i64: 1, 1>, scalar_prefetch = 0 : i64, scratch_operands = 0 : i64, tpu.core_type = #tpu.core_type<tc>, window_params = [{transform_indices = @transform_0, window_bounds = array<i64: 16, 128>}, {transform_indices = @transform_1, window_bounds = array<i64: 16, 128>}, {transform_indices = @transform_2, window_bounds = array<i64: 1, 8, 128>}]} {
    %c0_i32 = arith.constant 0 : i32
    %0 = arith.cmpi eq, %arg1, %c0_i32 : i32
    %1 = arith.extui %0 : i1 to i32
    %c0_i32_0 = arith.constant 0 : i32
    %2 = arith.cmpi ne, %1, %c0_i32_0 : i32
    scf.if %2 {
      %cst_10 = arith.constant 0.000000e+00 : f32
      %15 = vector.broadcast %cst_10 : f32 to vector<8x128xf32>
      %c0_11 = arith.constant 0 : index
      %c0_12 = arith.constant 0 : index
      %c0_13 = arith.constant 0 : index
      %16 = vector.load %arg4[%c0_11, %c0_12, %c0_13] : memref<1x8x128xf32, #tpu.memory_space<vmem>>, vector<1x8x128xf32>
      %17 = vector.shape_cast %16 : vector<1x8x128xf32> to vector<8x128xf32>
      %18 = vector.shape_cast %15 : vector<8x128xf32> to vector<1x8x128xf32>
      tpu.vector_store %arg4[%c0_11, %c0_12, %c0_13], %18 {strides = array<i32>} : memref<1x8x128xf32, #tpu.memory_space<vmem>>, vector<1x8x128xf32>,
    } else {
    }
    %c0 = arith.constant 0 : index
    %c0_1 = arith.constant 0 : index
    %3 = vector.load %arg2[%c0, %c0_1] : memref<16x128xf32, #tpu.memory_space<vmem>>, vector<16x128xf32>
    %c0_2 = arith.constant 0 : index
    %c0_3 = arith.constant 0 : index
    %4 = vector.load %arg3[%c0_2, %c0_3] : memref<16x128xf32, #tpu.memory_space<vmem>>, vector<16x128xf32>
    %5 = arith.subf %3, %4 : vector<16x128xf32>
    %6 = math.absf %5 : vector<16x128xf32>
    %c0_4 = arith.constant 0 : index
    %c0_5 = arith.constant 0 : index
    %c0_6 = arith.constant 0 : index
    %7 = vector.load %arg4[%c0_4, %c0_5, %c0_6] : memref<1x8x128xf32, #tpu.memory_space<vmem>>, vector<1x8x128xf32>
    %8 = vector.shape_cast %7 : vector<1x8x128xf32> to vector<8x128xf32>
    %9 = vector.shape_cast %6 : vector<16x128xf32> to vector<2x8x128xf32>
    %cst = arith.constant dense<0.000000e+00> : vector<8x128xf32>
    %10 = vector.multi_reduction <add>, %9, %cst [0] : vector<2x8x128xf32> to vector<8x128xf32>
    %11 = arith.addf %8, %10 : vector<8x128xf32>
    %c0_7 = arith.constant 0 : index
    %c0_8 = arith.constant 0 : index
    %c0_9 = arith.constant 0 : index
    %12 = vector.load %arg4[%c0_7, %c0_8, %c0_9] : memref<1x8x128xf32, #tpu.memory_space<vmem>>, vector<1x8x128xf32>
    %13 = vector.shape_cast %12 : vector<1x8x128xf32> to vector<8x128xf32>
    %14 = vector.shape_cast %11 : vector<8x128xf32> to vector<1x8x128xf32>
    tpu.vector_store %arg4[%c0_7, %c0_8, %c0_9], %14 {strides = array<i32>} : memref<1x8x128xf32, #tpu.memory_space<vmem>>, vector<1x8x128xf32>,
    return
  }
  func.func @transform_0(%arg0: i32, %arg1: i32) -> (i32, i32) {
    %c1_i32 = arith.constant 1 : i32
    %0 = arith.muli %arg0, %c1_i32 : i32
    %1 = arith.addi %0, %arg1 : i32
    %c0_i32 = arith.constant 0 : i32
    %c0_i32_0 = arith.constant 0 : i32
    return %1, %c0_i32 : i32, i32
  }
  func.func @transform_1(%arg0: i32, %arg1: i32) -> (i32, i32) {
    %c1_i32 = arith.constant 1 : i32
    %0 = arith.muli %arg0, %c1_i32 : i32
    %1 = arith.addi %0, %arg1 : i32
    %c0_i32 = arith.constant 0 : i32
    %c0_i32_0 = arith.constant 0 : i32
    return %1, %c0_i32 : i32, i32
  }
  func.func @transform_2(%arg0: i32, %arg1: i32) -> (i32, i32, i32) {
    %c0_i32 = arith.constant 0 : i32
    %c0_i32_0 = arith.constant 0 : i32
    %c0_i32_1 = arith.constant 0 : i32
    return %arg0, %c0_i32, %c0_i32_0 : i32, i32, i32
  }
}

</mosaic_0001>

<bundles_post_ra>
// kernel: _l1_loss.1
= control target key start
LH: loop header
LB: loop body
LE: loop exit
PB: predicated region body
PF: predicated region fallthrough
CT: control target
= control target key end

     0   :  { %s119_s0 = inlined_call_operand.vmem [shape: f32[16,128], index: 0, kind: input, shape index: {}]   ;;  %s120_s1 = inlined_call_operand.vmem [shape: f32[16,128], index: 1, kind: input, shape index: {}]   ;;  %s121_s2 = inlined_call_operand.vmem [shape: f32[1,8,128], index: 2, kind: output, shape index: {}]  }
   0x1   :  { %v60_v0 = vld [vmem:[%s119_s0] sm:$0xff]  ;;  %v61_v1 = vld [vmem:[%s119_s0 + $0x8] sm:$0xff] }
   0x2   :  { %v62_v2 = vld [vmem:[%s120_s1] sm:$0xff]  ;;  %v63_v3 = vld [vmem:[%s120_s1 + $0x8] sm:$0xff] }
   0x3   :  { %v64_v4 = vsub.f32 %v60_v0, %v62_v2  ;;  %v65_v5 = vsub.f32 %v61_v1, %v63_v3 }
   0x5   :  { %v66_v6 = vand.u32 2147483647, %v64_v4  ;;  %v67_v7 = vand.u32 2147483647, %v65_v5 }
   0x7   :  { %v69_v8 = vadd.f32 %v67_v7, %v66_v6 }
   0x9   :  { %71 = vst [vmem:[%s121_s2] sm:$0xff] %v69_v8 }

</bundles_post_ra>
